<compile_context>
chip_gen: v5e
topology: v5e:2x2
jax: 0.10.0
libtpu: 0.0.40
codegen_flags: <defaults>
</compile_context>

<pallas_src>
import jax
import jax.numpy as jnp
from jax.experimental import pallas as pl
from jax.experimental.pallas import tpu as pltpu


def _round_up(v, m):
    return (v + m - 1) // m * m


def _make_kernel(multilabel, unroll):
    def kernel(x_ref, w_ref, *rest):
        if multilabel:
            sel_ref, o_ref = rest
        else:
            (o_ref,) = rest
        n = x_ref.shape[1]
        w = w_ref[...]                                  # (N, 1) or (N, TC) f32
        if unroll:
            # Per-n accumulate into one (TB, TC_in) f32 accumulator; no f32
            # materialization of the whole (TB, N, TC_in) block.
            acc = x_ref[:, 0, :].astype(jnp.float32) * w[0]
            for i in range(1, n):
                acc = acc + x_ref[:, i, :].astype(jnp.float32) * w[i]
        else:
            # TODO(synk): for very large N switch to a fori_loop accumulator to
            # bound the live f32 temporary.
            acc = jnp.sum(x_ref[...].astype(jnp.float32) * w[None, :, :], axis=1)
        if multilabel:
            # Select the K=0 plane: (TB, TC*K) @ (TC*K, TC) one-hot matrix (MXU).
            acc = jnp.dot(acc, sel_ref[...], preferred_element_type=jnp.float32)
        o_ref[...] = acc.astype(o_ref.dtype)
    return kernel


def weighted_mean(x, weights, normalize_dim=1, multilabel=False, *,
                  target_block_bytes=None, vmem_limit_bytes=None,
                  unroll_max_n=32, tc_max_lanes=4096):
    """Pallas-backed WeightedMean forward.

    x: [B, N, C] (or [B, N, C, K] when multilabel=True; only [..., 0] is used).
    weights: 3-D module parameter with a size-1 batch dim, broadcastable
             against [B, N, C] (e.g. the usual weight_dims=(1, N, 1)).
    """
    x = jnp.asarray(x)
    w = jax.nn.softmax(jnp.asarray(weights, jnp.float32), axis=normalize_dim)

    if normalize_dim != 1:
        # TODO(synk): express the reduction-axis placement through the
        # BlockSpec/index_map instead of a physical HBM transpose.
        if multilabel:
            x = x[:, :, :, 0]
            multilabel = False
        x = jnp.moveaxis(x, normalize_dim, 1)
        w = jnp.moveaxis(w, normalize_dim, 1)

    if w.ndim != 3 or w.shape[0] != 1:
        raise NotImplementedError("weights must be 3-D with a size-1 batch dim")

    if multilabel:
        if x.ndim != 4:
            raise NotImplementedError("multilabel expects 4-D input [B, N, C, K]")
        b, n, c, k_fold = x.shape
        # Fold the K plane-selection into the kernel: view x as [B, N, C*K]
        # (free, layout-compatible reshape); plane 0 is picked inside the
        # kernel with a constant selection matrix -> no extra HBM slice pass.
        x = x.reshape(b, n, c * k_fold)
    else:
        if x.ndim != 3:
            raise NotImplementedError("expects 3-D input [B, N, C]")
        b, n, c = x.shape
        k_fold = 1

    if w.shape[1] not in (1, n) or w.shape[2] not in (1, c):
        raise NotImplementedError("weights are not broadcastable against x")
    wc = w.shape[2]
    if multilabel and wc != 1:
        # TODO(synk): apply per-class weights after the K-plane selection.
        raise NotImplementedError("per-class weights + multilabel not supported")
    # Natural small weight shape -- never materialize an (N, C) broadcast in HBM.
    w_arr = jnp.broadcast_to(w[0], (n, wc)).astype(jnp.float32)

    # ---- per-generation VMEM budget ----------------------------------------
    try:
        vmem_cap = int(pltpu.get_tpu_info().vmem_capacity_bytes)
    except Exception:
        vmem_cap = 64 * 1024 * 1024                     # v7x-like per-core VMEM
    big_vmem = vmem_cap >= 128 * 1024 * 1024            # v5e / v6e
    if vmem_limit_bytes is None:
        vmem_limit_bytes = (64 if big_vmem else 32) * 1024 * 1024
    if target_block_bytes is None:
        target_block_bytes = (8 if big_vmem else 4) * 1024 * 1024

    # ---- tile selection -----------------------------------------------------
    itemsize = x.dtype.itemsize
    if c % 128 == 0 and c > tc_max_lanes:
        tc = tc_max_lanes                                # lane-dense C tiles
    else:
        tc = c
        # TODO(synk): pad C to a multiple of 128 host-side when C is not
        # 128-aligned so output stores stay unmasked / lane-dense.

    def est_bytes(tb_, tc_):
        tci = tc_ * k_fold
        xb = tb_ * _round_up(n, 8) * _round_up(tci, 128) * itemsize
        ob = _round_up(tb_, 8) * _round_up(tc_, 128) * 4
        wb = _round_up(n, 8) * _round_up(tc_ if wc != 1 else 1, 128) * 4
        sb = _round_up(tci, 8) * _round_up(tc_, 128) * 4 if k_fold > 1 else 0
        return 2 * (xb + ob + wb + sb)                   # double-buffered

    vmem_budget = (vmem_limit_bytes * 3) // 5            # leave compiler headroom

    def row_bytes(tc_):
        return n * tc_ * k_fold * itemsize

    tb = max(1, min(b, target_block_bytes // max(1, row_bytes(tc))))
    # Prefer shrinking the C tile (more lane-parallel grid steps) over forcing
    # sub-8-row batch tiles when rows are huge; never round tb UP.
    while tb < min(b, 8) and c % 128 == 0 and tc > 128:
        tc = max(128, ((tc // 2) // 128) * 128)
        tb = max(1, min(b, target_block_bytes // max(1, row_bytes(tc))))
    if tb >= 8:
        tb = (tb // 8) * 8                               # sublane-align (round DOWN)
    while est_bytes(tb, tc) > vmem_budget:
        if tb > 8:
            tb = max(8, ((tb // 2) // 8) * 8)
        elif tb > 1:
            tb //= 2
        elif tc > 128 and c % 128 == 0:
            tc = max(128, ((tc // 2) // 128) * 128)
        else:
            break
    # v7x megacore: keep at least two "parallel" grid steps when B allows it.
    if pl.cdiv(b, tb) * pl.cdiv(c, tc) < 2 and b >= 16:
        tb = max(8, (pl.cdiv(b, 2) // 8) * 8)

    tc_in = tc * k_fold
    grid = (pl.cdiv(b, tb), pl.cdiv(c, tc))

    in_specs = [pl.BlockSpec((tb, n, tc_in), lambda i, j: (i, 0, j))]
    inputs = [x]
    if wc == 1:
        in_specs.append(pl.BlockSpec((n, 1), lambda i, j: (0, 0)))
    else:
        in_specs.append(pl.BlockSpec((n, tc), lambda i, j: (0, j)))
    inputs.append(w_arr)
    if multilabel:
        sel = (jnp.arange(tc_in)[:, None] == jnp.arange(tc)[None, :] * k_fold)
        in_specs.append(pl.BlockSpec((tc_in, tc), lambda i, j: (0, 0)))
        inputs.append(sel.astype(jnp.float32))

    kernel = _make_kernel(multilabel, unroll=(n <= unroll_max_n))

    return pl.pallas_call(
        kernel,
        out_shape=jax.ShapeDtypeStruct((b, c), jnp.float32),
        grid=grid,
        in_specs=in_specs,
        out_specs=pl.BlockSpec((tb, tc), lambda i, j: (i, j)),
        compiler_params=pltpu.CompilerParams(
            dimension_semantics=("parallel", "parallel"),
            vmem_limit_bytes=vmem_limit_bytes,
        ),
    )(*inputs)


def weighted_mean_ref(x, weights, normalize_dim=1, multilabel=False):
    """Pure-JAX reference mirroring the PyTorch module exactly."""
    x = jnp.asarray(x)
    x = x[:, :, :, 0] if multilabel else x
    w = jax.nn.softmax(jnp.asarray(weights, jnp.float32), axis=normalize_dim)
    return jnp.sum(x * w, axis=normalize_dim)


if __name__ == "__main__":
    key = jax.random.PRNGKey(0)
    k1, k2, k3, kw1, kw2 = jax.random.split(key, 5)

    B, N, C, K = 16, 8, 256, 3
    # Canonical module parameter: weight_dims=(1, N, 1), softmax over dim 1.
    weights = jax.random.normal(kw1, (1, N, 1), dtype=jnp.float32)

    # 1) f32 input, per-instance weights.
    x = jax.random.normal(k1, (B, N, C), dtype=jnp.float32)
    y = jax.block_until_ready(weighted_mean(x, weights, 1, False))
    y_ref = weighted_mean_ref(x, weights, 1, False)
    assert y.shape == (B, C)
    assert jnp.allclose(y, y_ref, atol=1e-5, rtol=1e-5), "f32 mismatch"

    # 2) bf16 input: native-dtype DMA, f32 accumulation inside the kernel.
    xb = jax.random.normal(k2, (B, N, C), dtype=jnp.bfloat16)
    yb = jax.block_until_ready(weighted_mean(xb, weights, 1, False))
    yb_ref = weighted_mean_ref(xb, weights, 1, False)
    assert jnp.allclose(yb, yb_ref, atol=1e-4, rtol=1e-3), "bf16 mismatch"

    # 3) per-class weights (weight_dims=(1, N, C)).
    weights_c = jax.random.normal(kw2, (1, N, C), dtype=jnp.float32)
    yc = jax.block_until_ready(weighted_mean(x, weights_c, 1, False))
    yc_ref = weighted_mean_ref(x, weights_c, 1, False)
    assert jnp.allclose(yc, yc_ref, atol=1e-5, rtol=1e-5), "per-class mismatch"

    # 4) multilabel: x [B, N, C, K]; the [..., 0] plane selection happens
    #    inside the Pallas kernel (no separate HBM slice pass).
    xm = jax.random.normal(k3, (B, N, C, K), dtype=jnp.float32)
    ym = jax.block_until_ready(weighted_mean(xm, weights, 1, True))
    ym_ref = weighted_mean_ref(xm, weights, 1, True)
    assert ym.shape == (B, C)
    assert jnp.allclose(ym, ym_ref, atol=1e-5, rtol=1e-5), "multilabel mismatch"

    print("KERNEL_OK")
</pallas_src>

<mosaic_0001>
module attributes {stable_mosaic.version = 11 : i64} {
  func.func @kernel(%arg0: i32, %arg1: i32, %arg2: memref<8x8x256xf32, #tpu.memory_space<vmem>>, %arg3: memref<8x1xf32, #tpu.memory_space<vmem>>, %arg4: memref<8x256xf32, #tpu.memory_space<vmem>>) attributes {dimension_semantics = [#tpu.dimension_semantics<parallel>, #tpu.dimension_semantics<parallel>], iteration_bounds = array<i64: 2, 1>, scalar_prefetch = 0 : i64, scratch_operands = 0 : i64, tpu.core_type = #tpu.core_type<tc>, window_params = [{transform_indices = @transform_0, window_bounds = array<i64: 8, 8, 256>}, {pipeline_mode = #tpu.pipeline_mode<synchronous>, transform_indices = @transform_1, window_bounds = array<i64: 8, 1>}, {transform_indices = @transform_2, window_bounds = array<i64: 8, 256>}]} {
    %c0 = arith.constant 0 : index
    %c0_0 = arith.constant 0 : index
    %0 = vector.load %arg3[%c0, %c0_0] : memref<8x1xf32, #tpu.memory_space<vmem>>, vector<8x1xf32>
    %c0_1 = arith.constant 0 : index
    %c0_2 = arith.constant 0 : index
    %c0_3 = arith.constant 0 : index
    %1 = vector.load %arg2[%c0_1, %c0_2, %c0_3] : memref<8x8x256xf32, #tpu.memory_space<vmem>>, vector<8x1x256xf32>
    %2 = vector.shape_cast %1 : vector<8x1x256xf32> to vector<8x256xf32>
    %3 = vector.extract_strided_slice %0 {offsets = [0, 0], sizes = [1, 1], strides = [1, 1]} : vector<8x1xf32> to vector<1x1xf32>
    %4 = vector.shape_cast %3 : vector<1x1xf32> to vector<1xf32>
    %5 = vector.shape_cast %4 : vector<1xf32> to vector<1x1xf32>
    %6 = vector.broadcast %5 : vector<1x1xf32> to vector<8x256xf32>
    %7 = arith.mulf %2, %6 : vector<8x256xf32>
    %c0_4 = arith.constant 0 : index
    %c1 = arith.constant 1 : index
    %c0_5 = arith.constant 0 : index
    %8 = vector.load %arg2[%c0_4, %c1, %c0_5] : memref<8x8x256xf32, #tpu.memory_space<vmem>>, vector<8x1x256xf32>
    %9 = vector.shape_cast %8 : vector<8x1x256xf32> to vector<8x256xf32>
    %10 = vector.extract_strided_slice %0 {offsets = [1, 0], sizes = [1, 1], strides = [1, 1]} : vector<8x1xf32> to vector<1x1xf32>
    %11 = vector.shape_cast %10 : vector<1x1xf32> to vector<1xf32>
    %12 = vector.shape_cast %11 : vector<1xf32> to vector<1x1xf32>
    %13 = vector.broadcast %12 : vector<1x1xf32> to vector<8x256xf32>
    %14 = arith.mulf %9, %13 : vector<8x256xf32>
    %15 = arith.addf %7, %14 : vector<8x256xf32>
    %c0_6 = arith.constant 0 : index
    %c2 = arith.constant 2 : index
    %c0_7 = arith.constant 0 : index
    %16 = vector.load %arg2[%c0_6, %c2, %c0_7] : memref<8x8x256xf32, #tpu.memory_space<vmem>>, vector<8x1x256xf32>
    %17 = vector.shape_cast %16 : vector<8x1x256xf32> to vector<8x256xf32>
    %18 = vector.extract_strided_slice %0 {offsets = [2, 0], sizes = [1, 1], strides = [1, 1]} : vector<8x1xf32> to vector<1x1xf32>
    %19 = vector.shape_cast %18 : vector<1x1xf32> to vector<1xf32>
    %20 = vector.shape_cast %19 : vector<1xf32> to vector<1x1xf32>
    %21 = vector.broadcast %20 : vector<1x1xf32> to vector<8x256xf32>
    %22 = arith.mulf %17, %21 : vector<8x256xf32>
    %23 = arith.addf %15, %22 : vector<8x256xf32>
    %c0_8 = arith.constant 0 : index
    %c3 = arith.constant 3 : index
    %c0_9 = arith.constant 0 : index
    %24 = vector.load %arg2[%c0_8, %c3, %c0_9] : memref<8x8x256xf32, #tpu.memory_space<vmem>>, vector<8x1x256xf32>
    %25 = vector.shape_cast %24 : vector<8x1x256xf32> to vector<8x256xf32>
    %26 = vector.extract_strided_slice %0 {offsets = [3, 0], sizes = [1, 1], strides = [1, 1]} : vector<8x1xf32> to vector<1x1xf32>
    %27 = vector.shape_cast %26 : vector<1x1xf32> to vector<1xf32>
    %28 = vector.shape_cast %27 : vector<1xf32> to vector<1x1xf32>
    %29 = vector.broadcast %28 : vector<1x1xf32> to vector<8x256xf32>
    %30 = arith.mulf %25, %29 : vector<8x256xf32>
    %31 = arith.addf %23, %30 : vector<8x256xf32>
    %c0_10 = arith.constant 0 : index
    %c4 = arith.constant 4 : index
    %c0_11 = arith.constant 0 : index
    %32 = vector.load %arg2[%c0_10, %c4, %c0_11] : memref<8x8x256xf32, #tpu.memory_space<vmem>>, vector<8x1x256xf32>
    %33 = vector.shape_cast %32 : vector<8x1x256xf32> to vector<8x256xf32>
    %34 = vector.extract_strided_slice %0 {offsets = [4, 0], sizes = [1, 1], strides = [1, 1]} : vector<8x1xf32> to vector<1x1xf32>
    %35 = vector.shape_cast %34 : vector<1x1xf32> to vector<1xf32>
    %36 = vector.shape_cast %35 : vector<1xf32> to vector<1x1xf32>
    %37 = vector.broadcast %36 : vector<1x1xf32> to vector<8x256xf32>
    %38 = arith.mulf %33, %37 : vector<8x256xf32>
    %39 = arith.addf %31, %38 : vector<8x256xf32>
    %c0_12 = arith.constant 0 : index
    %c5 = arith.constant 5 : index
    %c0_13 = arith.constant 0 : index
    %40 = vector.load %arg2[%c0_12, %c5, %c0_13] : memref<8x8x256xf32, #tpu.memory_space<vmem>>, vector<8x1x256xf32>
    %41 = vector.shape_cast %40 : vector<8x1x256xf32> to vector<8x256xf32>
    %42 = vector.extract_strided_slice %0 {offsets = [5, 0], sizes = [1, 1], strides = [1, 1]} : vector<8x1xf32> to vector<1x1xf32>
    %43 = vector.shape_cast %42 : vector<1x1xf32> to vector<1xf32>
    %44 = vector.shape_cast %43 : vector<1xf32> to vector<1x1xf32>
    %45 = vector.broadcast %44 : vector<1x1xf32> to vector<8x256xf32>
    %46 = arith.mulf %41, %45 : vector<8x256xf32>
    %47 = arith.addf %39, %46 : vector<8x256xf32>
    %c0_14 = arith.constant 0 : index
    %c6 = arith.constant 6 : index
    %c0_15 = arith.constant 0 : index
    %48 = vector.load %arg2[%c0_14, %c6, %c0_15] : memref<8x8x256xf32, #tpu.memory_space<vmem>>, vector<8x1x256xf32>
    %49 = vector.shape_cast %48 : vector<8x1x256xf32> to vector<8x256xf32>
    %50 = vector.extract_strided_slice %0 {offsets = [6, 0], sizes = [1, 1], strides = [1, 1]} : vector<8x1xf32> to vector<1x1xf32>
    %51 = vector.shape_cast %50 : vector<1x1xf32> to vector<1xf32>
    %52 = vector.shape_cast %51 : vector<1xf32> to vector<1x1xf32>
    %53 = vector.broadcast %52 : vector<1x1xf32> to vector<8x256xf32>
    %54 = arith.mulf %49, %53 : vector<8x256xf32>
    %55 = arith.addf %47, %54 : vector<8x256xf32>
    %c0_16 = arith.constant 0 : index
    %c7 = arith.constant 7 : index
    %c0_17 = arith.constant 0 : index
    %56 = vector.load %arg2[%c0_16, %c7, %c0_17] : memref<8x8x256xf32, #tpu.memory_space<vmem>>, vector<8x1x256xf32>
    %57 = vector.shape_cast %56 : vector<8x1x256xf32> to vector<8x256xf32>
    %58 = vector.extract_strided_slice %0 {offsets = [7, 0], sizes = [1, 1], strides = [1, 1]} : vector<8x1xf32> to vector<1x1xf32>
    %59 = vector.shape_cast %58 : vector<1x1xf32> to vector<1xf32>
    %60 = vector.shape_cast %59 : vector<1xf32> to vector<1x1xf32>
    %61 = vector.broadcast %60 : vector<1x1xf32> to vector<8x256xf32>
    %62 = arith.mulf %57, %61 : vector<8x256xf32>
    %63 = arith.addf %55, %62 : vector<8x256xf32>
    %c0_18 = arith.constant 0 : index
    %c0_19 = arith.constant 0 : index
    %64 = vector.load %arg4[%c0_18, %c0_19] : memref<8x256xf32, #tpu.memory_space<vmem>>, vector<8x256xf32>
    tpu.vector_store %arg4[%c0_18, %c0_19], %63 {strides = array<i32>} : memref<8x256xf32, #tpu.memory_space<vmem>>, vector<8x256xf32>,
    return
  }
  func.func @transform_0(%arg0: i32, %arg1: i32) -> (i32, i32, i32) {
    %c0_i32 = arith.constant 0 : i32
    %c0_i32_0 = arith.constant 0 : i32
    return %arg0, %c0_i32, %arg1 : i32, i32, i32
  }
  func.func @transform_1(%arg0: i32, %arg1: i32) -> (i32, i32) {
    %c0_i32 = arith.constant 0 : i32
    %c0_i32_0 = arith.constant 0 : i32
    %c0_i32_1 = arith.constant 0 : i32
    return %c0_i32, %c0_i32_0 : i32, i32
  }
  func.func @transform_2(%arg0: i32, %arg1: i32) -> (i32, i32) {
    %c0_i32 = arith.constant 0 : i32
    return %arg0, %arg1 : i32, i32
  }
}

</mosaic_0001>

<bundles_post_ra>
// kernel: tpu_custom_call.1
= control target key start
LH: loop header
LB: loop body
LE: loop exit
PB: predicated region body
PF: predicated region fallthrough
CT: control target
= control target key end

     0   :  { %7 = vsyncpa [#allocation3], 0  ;;  %s1081_s0 = inlined_call_operand.hbm [shape: f32[16,8,256], index: 0, kind: input, shape index: {}]   ;;  %s1082_s1 = inlined_call_operand.vmem [shape: f32[8,1], index: 1, kind: input, shape index: {}]   ;;  %s1083_s2 = inlined_call_operand.hbm [shape: f32[16,256], index: 2, kind: output, shape index: {}]  }
   0x1   :  { %9 = vsyncpa [#allocation3 + $0x1], 0 }
   0x2   :  { %10 = vsyncpa [#allocation4], 0 }
   0x3   :  { %12 = vsyncpa [#allocation4 + $0x1], 0  ;;  %s891_s9 = smov 0   ;;  %s893_s10 = smov 0  }
   0x4   :  { %s895_s11 = smov 0   ;;  %s897_s12 = smov 0  }
   0x5   :  { %s899_s13 = smov 0   ;;  %s901_s14 = smov 0  }
   0x6 LB: > { %s598_s15 = sadd.s32 4294967295, %s872_s14   ;;  %s599_s16 = sadd.s32 4294967294, %s872_s14   ;;  %s872_s14 = sphi %s901_s14, %s18_s14   ;;  %s868_s13 = sphi %s899_s13, %s1092_s13   ;;  %s864_s12 = sphi %s897_s12, %s1091_s12   ;;  %s860_s11 = sphi %s895_s11, %s1090_s11   ;;  %s856_s10 = sphi %s893_s10, %s1089_s10   ;;  %s852_s9 = sphi %s891_s9, %s1088_s9  }
   0x7   : > { %s30_s17 = sadd.s32 1, %s868_s13  ;;  %s39_s18 = sadd.s32 1, %s860_s11 }
   0x8   : > { %p32_p0 = scmp.ge.s32.totalorder %s30_s17, 2  ;;  %p46_p1 = scmp.ne.s32.totalorder %s860_s11, %s856_s10 }
   0x9   : > { %p47_p2 = scmp.eq.s32.totalorder %s872_s14, 0  ;;  %p52_p3 = scmp.ne.s32.totalorder %s856_s10, %s852_s9 }
   0xa   : > { %s1094_s17 = smov (%p32_p0, %s30_s17), 0  ;;  %p53_p5 = scmp.eq.s32.totalorder %s598_s15, 0 }
   0xb   : > { %p932_p4 = por %p47_p2, %p46_p1  ;;  %s34_s20 = ssub.s32 %s868_s13, %s1094_s17 }
   0xc   : > { %p99_p6 = scmp.eq.s32.totalorder %s598_s15, 1  ;;  %p37_p7 = scmp.eq.s32.totalorder %s34_s20, 0 }
   0xd   : > { %p938_p8 = por %p53_p5, %p52_p3  ;;  %p105_p10 = scmp.eq.s32.totalorder %s599_s16, 1 }
   0xe   : > { %p942_p9 = por %p99_p6, %p46_p1  ;;  %p601_p12 = scmp.ge.s32.totalorder %s872_s14, 2 }
   0xf   : > { %s947_s23 = scalar_select %p37_p7, %s860_s11, %s39_s18  }
  0x10   : > { %p949_p11 = por %p105_p10, %p52_p3  ;;  %p708_p13 = scmp.lt.s32.totalorder %s872_s14, 2 }
  0x11   : > { %s128_s25 = sand.u32 1, %s860_s11   ;;  %s678_s27 = sshll.u32 %s868_s13, 7 }
  0x12   : > { %s602_s26 = sshll.u32 %s128_s25, 7  ;;  %s140_s30 = scalar_lea.hbm %s1081_s0, %s678_s27 }
  0x13   : > { %s132_s3 = scalar_lea.vmem [#allocation2], %s602_s26  ;;  %s141_s5 = sshll.u32 %s140_s30, 4  ;;  %s142_s5 = int_to_ptr.hbm [resolvable:$true] %s141_s5 }
  0x14   : > { %s143_s4 = sshll.u32 %s132_s3, 4  ;;  %p701_p0 = pnand %p708_p13, %p932_p4  ;;  %s144_s4 = int_to_ptr.vmem [resolvable:$true] %s143_s4 }
  0x15   : > { %p606_p1 = scmp.ge.s32.totalorder %s872_s14, 1  ;;  %s129_s6 = scalar_lea.sflag [#allocation3], %s128_s25 }
  0x16   : > { %s874_s7 = smov 256   ;;  %s875_s8 = smov 16  }
  0x17   : > { %703 = dma.hbm_to_vmem [thread:$0]  (!%p701_p0), %s142_s5, 2048, %s144_s4, %s129_s6, %s874_s7, %s874_s7, %s875_s8  }
  0x18   : > { %p151_p2 = scmp.lt.s32.totalorder %s872_s14, 3 }
  0x1a   : > { %p152_p3 = pnand %p606_p1, %p151_p2 }
  0x1b   : > { %s965_s15 = sand.u32 (!%p152_p3), 1, %s856_s10  }
  0x1c   : > { %155 = sbr.rel (%p152_p3) target bundleno = 137 (0x89), region = 28  ;;  %s607_s16 = sshll.u32 (!%p152_p3), %s965_s15, 7 }
  0x1d   : > { %s158_s18 = scalar_lea.sflag (!%p152_p3), [#allocation3], %s965_s15  ;;  %s969_s20 = scalar_lea.vmem (!%p152_p3), [#allocation2], %s607_s16 }
  0x21   : > { %843 = dma.done.wait (%p938_p8), %s158_s18, 2048  }
  0x22   : > { %845 = vsyncadd (%p938_p8), %s158_s18, 4294965248  ;;  %v186_v0 = vld [vmem:[%s1082_s1] sm:$0xff]  ;;  %v187_v8 = vld [vmem:[%s969_s20] ss:$8 sm:$0x3]  ;;  %s608_s5 = sshll.u32 %s965_s15, 4 }
  0x23   : > { %680 = vpush %v186_v0  ;;  %v230_v1 = vrot.slane %v186_v0, 1  ;;  %v266_v2 = vrot.slane %v186_v0, 2  ;;  %v302_v3 = vrot.slane %v186_v0, 3  ;;  %v338_v4 = vrot.slane %v186_v0, 4  ;;  %s679_s6 = sshll.u32 %s864_s12, 4  ;;  %s182_s18 = scalar_lea.vmem [#allocation5], %s608_s5 }
  0x24   : > { %v374_v5 = vrot.slane %v186_v0, 5  ;;  %v410_v6 = vrot.slane %v186_v0, 6  ;;  %v446_v7 = vrot.slane %v186_v0, 7  ;;  %v609_v9 = vld [vmem:[%s969_s20 + $0x10] ss:$8 sm:$0x3]  ;;  %s509_s16 = scalar_lea.hbm %s1083_s2, %s679_s6 }
  0x25   : > { %682 = vpush %v230_v1  ;;  %v610_v10 = vld [vmem:[%s969_s20 + $0x20] ss:$8 sm:$0x3]  ;;  %v611_v11 = vld [vmem:[%s969_s20 + $0x30] ss:$8 sm:$0x3] }
  0x26   : > { %684 = vpush %v266_v2  ;;  %v612_v12 = vld [vmem:[%s969_s20 + $0x40] ss:$8 sm:$0x3]  ;;  %v613_v13 = vld [vmem:[%s969_s20 + $0x50] ss:$8 sm:$0x3] }
  0x27   : > { %686 = vpush %v302_v3  ;;  %v614_v14 = vld [vmem:[%s969_s20 + $0x60] ss:$8 sm:$0x3]  ;;  %v615_v15 = vld [vmem:[%s969_s20 + $0x70] ss:$8 sm:$0x3] }
  0x28   : > { %688 = vpush %v338_v4  ;;  %v616_v16 = vld [vmem:[%s969_s20 + $0x1] ss:$8 sm:$0x3]  ;;  %v617_v17 = vld [vmem:[%s969_s20 + $0x11] ss:$8 sm:$0x3] }
  0x29   : > { %690 = vpush %v374_v5  ;;  %v618_v19 = vld [vmem:[%s969_s20 + $0x21] ss:$8 sm:$0x3]  ;;  %v619_v20 = vld [vmem:[%s969_s20 + $0x31] ss:$8 sm:$0x3] }
  0x2a   : > { %692 = vpush %v410_v6  ;;  %v620_v23 = vld [vmem:[%s969_s20 + $0x41] ss:$8 sm:$0x3]  ;;  %v621_v24 = vld [vmem:[%s969_s20 + $0x51] ss:$8 sm:$0x3] }
  0x2b   : > { %694 = vpush %v446_v7  ;;  %v622_v29 = vld [vmem:[%s969_s20 + $0x61] ss:$8 sm:$0x3]  ;;  %v623_v30 = vld [vmem:[%s969_s20 + $0x71] ss:$8 sm:$0x3] }
  0x2c   : > { %v624_v34 = vld [vmem:[%s969_s20 + $0x2] ss:$8 sm:$0x3]  ;;  %v625_v35 = vld [vmem:[%s969_s20 + $0x12] ss:$8 sm:$0x3] }
  0x2d   : > { %v626_v41 = vld [vmem:[%s969_s20 + $0x22] ss:$8 sm:$0x3]  ;;  %v627_v42 = vld [vmem:[%s969_s20 + $0x32] ss:$8 sm:$0x3] }
  0x2e   : > { %v628_v47 = vld [vmem:[%s969_s20 + $0x42] ss:$8 sm:$0x3]  ;;  %v629_v48 = vld [vmem:[%s969_s20 + $0x52] ss:$8 sm:$0x3] }
  0x2f   : > { %v630_v53 = vld [vmem:[%s969_s20 + $0x62] ss:$8 sm:$0x3]  ;;  %v631_v54 = vld [vmem:[%s969_s20 + $0x72] ss:$8 sm:$0x3] }
  0x30   : > { %v632_v63 = vld [vmem:[%s969_s20 + $0x3] ss:$8 sm:$0x3]  ;;  %v633_v0 = vld [vmem:[%s969_s20 + $0x13] ss:$8 sm:$0x3] }
  0x31   : > { %v634_v5 = vld [vmem:[%s969_s20 + $0x23] ss:$8 sm:$0x3]  ;;  %v635_v6 = vld [vmem:[%s969_s20 + $0x33] ss:$8 sm:$0x3] }
  0x32   : > { %s513_s19 = sshll.u32 %s509_s16, 4  ;;  %s496_s25 = scalar_lea.sflag [#allocation4], %s965_s15  ;;  %s514_s19 = int_to_ptr.hbm [resolvable:$true] %s513_s19 }
  0x54   : > { %s681_s21 = spop %680 }
  0x55   : > { %v204_v18 = vstv %s681_s21  ;;  %s804_s21 = sshra.s32 %s514_s19, 4  ;;  %s805_s21 = int_to_ptr.hbm [resolvable:$true] %s804_s21 }
  0x56   : > { %v206_v21 = vmul.f32 %v204_v18, %v187_v8  ;;  %v207_v22 = vmul.f32 %v609_v9, %v204_v18  ;;  %s683_s26 = spop %682  ;;  %v208_v25 = vmul.f32 %v610_v10, %v204_v18  ;;  %v209_v26 = vmul.f32 %v611_v11, %v204_v18  ;;  %v636_v10 = vld [vmem:[%s969_s20 + $0x43] ss:$8 sm:$0x3]  ;;  %v637_v11 = vld [vmem:[%s969_s20 + $0x53] ss:$8 sm:$0x3]  ;;  %p811_p7 = scmp.lt.s32.totalorder %s805_s21, %s1083_s2 }
  0x57   : > { %v210_v27 = vmul.f32 %v612_v12, %v204_v18  ;;  %v211_v28 = vmul.f32 %v613_v13, %v204_v18  ;;  %s685_s27 = spop %684  ;;  %v212_v31 = vmul.f32 %v614_v14, %v204_v18  ;;  %v213_v32 = vmul.f32 %v615_v15, %v204_v18  ;;  %s806_s12 = scalar_lea.hbm %s805_s21, 16 }
  0x58   : > { %v232_v33 = vstv %s683_s26  ;;  %v268_v36 = vstv %s685_s27  ;;  %s687_s28 = spop %686  ;;  %p807_p4 = scmp.ne.s32.totalorder %s805_s21, %s806_s12 }
  0x59   : > { %v234_v37 = vmul.f32 %v616_v16, %v232_v33  ;;  %v235_v38 = vmul.f32 %v617_v17, %v232_v33  ;;  %v236_v39 = vmul.f32 %v618_v19, %v232_v33  ;;  %v237_v40 = vmul.f32 %v619_v20, %v232_v33  ;;  %s689_s29 = spop %688  ;;  %v638_v16 = vld [vmem:[%s969_s20 + $0x63] ss:$8 sm:$0x3]  ;;  %v639_v17 = vld [vmem:[%s969_s20 + $0x73] ss:$8 sm:$0x3] }
  0x5a   : > { %v238_v43 = vmul.f32 %v620_v23, %v232_v33  ;;  %v239_v44 = vmul.f32 %v621_v24, %v232_v33  ;;  %v240_v45 = vmul.f32 %v622_v29, %v232_v33  ;;  %v241_v46 = vmul.f32 %v623_v30, %v232_v33  ;;  %s691_s30 = spop %690  ;;  %v640_v20 = vld [vmem:[%s969_s20 + $0x4] ss:$8 sm:$0x3]  ;;  %v643_v29 = vld [vmem:[%s969_s20 + $0x34] ss:$8 sm:$0x3]  ;;  %p808_p5 = pnand %p807_p4, %p942_p9 }
  0x5b   : > { %v242_v49 = vadd.f32 %v234_v37, %v206_v21  ;;  %v243_v50 = vadd.f32 %v235_v38, %v207_v22  ;;  %v244_v51 = vadd.f32 %v236_v39, %v208_v25  ;;  %v245_v52 = vadd.f32 %v237_v40, %v209_v26  ;;  %v641_v21 = vld [vmem:[%s969_s20 + $0x14] ss:$8 sm:$0x3]  ;;  %v646_v40 = vld [vmem:[%s969_s20 + $0x64] ss:$8 sm:$0x3]  ;;  %s693_s3 = spop %692 }
  0x5c   : > { %v246_v55 = vadd.f32 %v238_v43, %v210_v27  ;;  %v247_v56 = vadd.f32 %v239_v44, %v211_v28  ;;  %v248_v57 = vadd.f32 %v240_v45, %v212_v31  ;;  %v249_v58 = vadd.f32 %v241_v46, %v213_v32  ;;  %v642_v28 = vld [vmem:[%s969_s20 + $0x24] ss:$8 sm:$0x3]  ;;  %s695_s4 = spop %694  ;;  %p809_p6 = pneg %p808_p5 }
  0x5d   : > { %v270_v59 = vmul.f32 %v624_v34, %v268_v36  ;;  %v271_v60 = vmul.f32 %v625_v35, %v268_v36  ;;  %v272_v61 = vmul.f32 %v626_v41, %v268_v36  ;;  %v273_v62 = vmul.f32 %v627_v42, %v268_v36  ;;  %v644_v34 = vld [vmem:[%s969_s20 + $0x44] ss:$8 sm:$0x3]  ;;  %v645_v35 = vld [vmem:[%s969_s20 + $0x54] ss:$8 sm:$0x3] }
  0x5e   : > { %v274_v1 = vmul.f32 %v628_v47, %v268_v36  ;;  %v275_v2 = vmul.f32 %v629_v48, %v268_v36  ;;  %v276_v3 = vmul.f32 %v630_v53, %v268_v36  ;;  %v277_v4 = vmul.f32 %v631_v54, %v268_v36  ;;  %v647_v41 = vld [vmem:[%s969_s20 + $0x74] ss:$8 sm:$0x3] }
  0x5f   : > { %v278_v7 = vadd.f32 %v270_v59, %v242_v49  ;;  %v279_v8 = vadd.f32 %v271_v60, %v243_v50  ;;  %v280_v9 = vadd.f32 %v272_v61, %v244_v51  ;;  %v281_v12 = vadd.f32 %v273_v62, %v245_v52  ;;  %v648_v50 = vld [vmem:[%s969_s20 + $0x5] ss:$8 sm:$0x3]  ;;  %v649_v51 = vld [vmem:[%s969_s20 + $0x15] ss:$8 sm:$0x3] }
  0x60   : > { %v282_v13 = vadd.f32 %v274_v1, %v246_v55  ;;  %v283_v14 = vadd.f32 %v275_v2, %v247_v56  ;;  %v284_v15 = vadd.f32 %v276_v3, %v248_v57  ;;  %v285_v18 = vadd.f32 %v277_v4, %v249_v58  ;;  %v650_v56 = vld [vmem:[%s969_s20 + $0x25] ss:$8 sm:$0x3]  ;;  %v651_v57 = vld [vmem:[%s969_s20 + $0x35] ss:$8 sm:$0x3] }
  0x61   : > { %v304_v19 = vstv %s687_s28  ;;  %v340_v22 = vstv %s689_s29  ;;  %v376_v23 = vstv %s691_s30  ;;  %v652_v59 = vld [vmem:[%s969_s20 + $0x45] ss:$8 sm:$0x3]  ;;  %s810_s28 = scalar_lea.hbm %s1083_s2, 32 }
  0x62   : > { %v306_v24 = vmul.f32 %v632_v63, %v304_v19  ;;  %v307_v25 = vmul.f32 %v633_v0, %v304_v19  ;;  %v308_v26 = vmul.f32 %v634_v5, %v304_v19  ;;  %v309_v27 = vmul.f32 %v635_v6, %v304_v19  ;;  %v653_v60 = vld [vmem:[%s969_s20 + $0x55] ss:$8 sm:$0x3]  ;;  %v654_v2 = vld [vmem:[%s969_s20 + $0x65] ss:$8 sm:$0x3]  ;;  %p812_p8 = scmp.lt.s32.totalorder %s810_s28, %s806_s12 }
  0x63   : > { %v310_v30 = vmul.f32 %v636_v10, %v304_v19  ;;  %v311_v31 = vmul.f32 %v637_v11, %v304_v19  ;;  %v312_v32 = vmul.f32 %v638_v16, %v304_v19  ;;  %v313_v33 = vmul.f32 %v639_v17, %v304_v19  ;;  %v655_v3 = vld [vmem:[%s969_s20 + $0x75] ss:$8 sm:$0x3] }
  0x64   : > { %v314_v36 = vadd.f32 %v306_v24, %v278_v7  ;;  %v315_v37 = vadd.f32 %v307_v25, %v279_v8  ;;  %v316_v38 = vadd.f32 %v308_v26, %v280_v9  ;;  %v317_v39 = vadd.f32 %v309_v27, %v281_v12  ;;  %v656_v8 = vld [vmem:[%s969_s20 + $0x6] ss:$8 sm:$0x3]  ;;  %v657_v9 = vld [vmem:[%s969_s20 + $0x16] ss:$8 sm:$0x3]  ;;  %p813_p10 = por %p812_p8, %p811_p7 }
  0x65   : > { %v318_v42 = vadd.f32 %v310_v30, %v282_v13  ;;  %v319_v43 = vadd.f32 %v311_v31, %v283_v14  ;;  %v320_v44 = vadd.f32 %v312_v32, %v284_v15  ;;  %v321_v45 = vadd.f32 %v313_v33, %v285_v18  ;;  %v658_v14 = vld [vmem:[%s969_s20 + $0x26] ss:$8 sm:$0x3]  ;;  %v659_v15 = vld [vmem:[%s969_s20 + $0x36] ss:$8 sm:$0x3] }
  0x66   : > { %v342_v46 = vmul.f32 %v640_v20, %v340_v22  ;;  %v343_v47 = vmul.f32 %v641_v21, %v340_v22  ;;  %v344_v48 = vmul.f32 %v642_v28, %v340_v22  ;;  %v345_v49 = vmul.f32 %v643_v29, %v340_v22  ;;  %v660_v20 = vld [vmem:[%s969_s20 + $0x46] ss:$8 sm:$0x3]  ;;  %v661_v26 = vld [vmem:[%s969_s20 + $0x56] ss:$8 sm:$0x3]  ;;  %p814_p13 = pnand %p813_p10, %p809_p6 }
  0x67   : > { %v346_v52 = vmul.f32 %v644_v34, %v340_v22  ;;  %v347_v53 = vmul.f32 %v645_v35, %v340_v22  ;;  %v348_v54 = vmul.f32 %v646_v40, %v340_v22  ;;  %v349_v55 = vmul.f32 %v647_v41, %v340_v22  ;;  %v662_v27 = vld [vmem:[%s969_s20 + $0x66] ss:$8 sm:$0x3]  ;;  %v663_v28 = vld [vmem:[%s969_s20 + $0x76] ss:$8 sm:$0x3] }
  0x68   : > { %v350_v58 = vadd.f32 %v342_v46, %v314_v36  ;;  %v412_v61 = vstv %s693_s3  ;;  %v351_v62 = vadd.f32 %v343_v47, %v315_v37  ;;  %v352_v63 = vadd.f32 %v344_v48, %v316_v38  ;;  %v665_v34 = vld [vmem:[%s969_s20 + $0x17] ss:$8 sm:$0x3] }
  0x69   : > { %v353_v0 = vadd.f32 %v345_v49, %v317_v39  ;;  %v354_v1 = vadd.f32 %v346_v52, %v318_v42  ;;  %v378_v4 = vmul.f32 %v648_v50, %v376_v23  ;;  %v379_v5 = vmul.f32 %v649_v51, %v376_v23  ;;  %v666_v39 = vld [vmem:[%s969_s20 + $0x27] ss:$8 sm:$0x3]  ;;  %v667_v40 = vld [vmem:[%s969_s20 + $0x37] ss:$8 sm:$0x3] }
  0x6a   : > { %v380_v6 = vmul.f32 %v650_v56, %v376_v23  ;;  %v381_v7 = vmul.f32 %v651_v57, %v376_v23  ;;  %v355_v10 = vadd.f32 %v347_v53, %v319_v43  ;;  %v356_v11 = vadd.f32 %v348_v54, %v320_v44  ;;  %v669_v46 = vld [vmem:[%s969_s20 + $0x57] ss:$8 sm:$0x3]  ;;  %v670_v50 = vld [vmem:[%s969_s20 + $0x67] ss:$8 sm:$0x3] }
  0x6b   : > { %v357_v12 = vadd.f32 %v349_v55, %v321_v45  ;;  %v382_v13 = vmul.f32 %v652_v59, %v376_v23  ;;  %v383_v16 = vmul.f32 %v653_v60, %v376_v23  ;;  %v384_v17 = vmul.f32 %v654_v2, %v376_v23  ;;  %v668_v45 = vld [vmem:[%s969_s20 + $0x47] ss:$8 sm:$0x3]  ;;  %v671_v52 = vld [vmem:[%s969_s20 + $0x77] ss:$8 sm:$0x3] }
  0x6c   : > { %v385_v18 = vmul.f32 %v655_v3, %v376_v23  ;;  %v386_v19 = vadd.f32 %v378_v4, %v350_v58  ;;  %v387_v21 = vadd.f32 %v379_v5, %v351_v62  ;;  %v388_v22 = vadd.f32 %v380_v6, %v352_v63  ;;  %v664_v23 = vld [vmem:[%s969_s20 + $0x7] ss:$8 sm:$0x3]  ;;  %s511_s20 = sshll.u32 %s182_s18, 4  ;;  %s512_s20 = int_to_ptr.vmem [resolvable:$true] %s511_s20 }
  0x6d   : > { %v389_v24 = vadd.f32 %v381_v7, %v353_v0  ;;  %v390_v25 = vadd.f32 %v382_v13, %v354_v1  ;;  %v414_v29 = vmul.f32 %v656_v8, %v412_v61  ;;  %v415_v30 = vmul.f32 %v657_v9, %v412_v61 }
  0x6e   : > { %v416_v31 = vmul.f32 %v658_v14, %v412_v61  ;;  %v417_v32 = vmul.f32 %v659_v15, %v412_v61  ;;  %v418_v33 = vmul.f32 %v660_v20, %v412_v61  ;;  %v391_v35 = vadd.f32 %v383_v16, %v355_v10 }
  0x6f   : > { %v392_v36 = vadd.f32 %v384_v17, %v356_v11  ;;  %v419_v37 = vmul.f32 %v661_v26, %v412_v61  ;;  %v420_v38 = vmul.f32 %v662_v27, %v412_v61  ;;  %v393_v41 = vadd.f32 %v385_v18, %v357_v12 }
  0x70   : > { %v422_v42 = vadd.f32 %v414_v29, %v386_v19  ;;  %v423_v43 = vadd.f32 %v415_v30, %v387_v21  ;;  %v424_v44 = vadd.f32 %v416_v31, %v388_v22  ;;  %v421_v47 = vmul.f32 %v663_v28, %v412_v61 }
  0x71   : > { %v425_v48 = vadd.f32 %v417_v32, %v389_v24  ;;  %v426_v49 = vadd.f32 %v418_v33, %v390_v25  ;;  %v448_v51 = vstv %s695_s4  ;;  %v427_v57 = vadd.f32 %v419_v37, %v391_v35 }
  0x72   : > { %v450_v53 = vmul.f32 %v664_v23, %v448_v51  ;;  %v451_v54 = vmul.f32 %v665_v34, %v448_v51  ;;  %v452_v55 = vmul.f32 %v666_v39, %v448_v51  ;;  %v453_v56 = vmul.f32 %v667_v40, %v448_v51 }
  0x73   : > { %v428_v58 = vadd.f32 %v420_v38, %v392_v36  ;;  %v454_v59 = vmul.f32 %v668_v45, %v448_v51  ;;  %v455_v60 = vmul.f32 %v669_v46, %v448_v51  ;;  %v456_v62 = vmul.f32 %v670_v50, %v448_v51 }
  0x74   : > { %v458_v63 = vadd.f32 %v450_v53, %v422_v42  ;;  %v459_v0 = vadd.f32 %v451_v54, %v423_v43  ;;  %v460_v1 = vadd.f32 %v452_v55, %v424_v44  ;;  %v429_v61 = vadd.f32 %v421_v47, %v393_v41 }
  0x75   : > { %v457_v2 = vmul.f32 %v671_v52, %v448_v51  ;;  %v461_v3 = vadd.f32 %v453_v56, %v425_v48  ;;  %v462_v4 = vadd.f32 %v454_v59, %v426_v49  ;;  %v463_v5 = vadd.f32 %v455_v60, %v427_v57 }
  0x76   : > { %474 = vst [vmem:[#allocation1] ss:$9 sm:$0xff] %v458_v63  ;;  %v464_v6 = vadd.f32 %v456_v62, %v428_v58 }
  0x77   : > { %476 = vst [vmem:[#allocation1 + $0x1] ss:$9 sm:$0xff] %v459_v0  ;;  %v465_v7 = vadd.f32 %v457_v2, %v429_v61 }
  0x78   : > { %478 = vst [vmem:[#allocation1 + $0x2] ss:$9 sm:$0xff] %v460_v1 }
  0x79   : > { %480 = vst [vmem:[#allocation1 + $0x3] ss:$9 sm:$0xff] %v461_v3 }
  0x7a   : > { %482 = vst [vmem:[#allocation1 + $0x4] ss:$9 sm:$0xff] %v462_v4 }
  0x7b   : > { %484 = vst [vmem:[#allocation1 + $0x5] ss:$9 sm:$0xff] %v463_v5 }
  0x7c   : > { %486 = vst [vmem:[#allocation1 + $0x6] ss:$9 sm:$0xff] %v464_v6 }
  0x7d   : > { %488 = vst [vmem:[#allocation1 + $0x7] ss:$9 sm:$0xff] %v465_v7 }
  0x84   : > { %v489_v8 = vld [vmem:[#allocation1] sm:$0xff]  ;;  %v490_v9 = vld [vmem:[#allocation1 + $0x9] sm:$0xff] }
  0x85   : > { %493 = vst [vmem:[%s182_s18] sm:$0xff] %v489_v8 }
  0x86   : > { %494 = vst [vmem:[%s182_s18 + $0x8] sm:$0xff] %v490_v9 }
  0x87   : > { %817 = shalt.err (!%p814_p13)
}
  0x88   : > { %698 = dma.vmem_to_hbm [thread:$0]  (%p942_p9), %s512_s20, 256, %s514_s19, %s496_s25  }
  0x89 PF: > { %s525_s15 = sand.u32 1, %s852_s9   ;;  %p705_p0 = pnand %p601_p12, %p949_p11 }
  0x8a   : > { %s526_s3 = scalar_lea.sflag [#allocation4], %s525_s15 }
  0x8b   : > { %p706_p1 = pneg %p705_p0 }
  0x8d   : > { %847 = dma.done.wait (%p706_p1), %s526_s3, 256  }
  0x8e   : > { %849 = vsyncadd (%p706_p1), %s526_s3, 4294967040  ;;  %s18_s14 = sadd.s32 1, %s872_s14   ;;  %s1088_s9 = smov %s856_s10 }
  0x8f   : > { %p15_p2 = scmp.ge.s32.totalorder %s18_s14, 4   ;;  %s1089_s10 = smov %s860_s11 }
  0x90   : > { %s1090_s11 = smov %s947_s23  ;;  %s1091_s12 = smov %s868_s13 }
  0x91   : > { %s1092_s13 = smov %s1094_s17  ;;  %17 = sbr.rel (!%p15_p2) target bundleno = 6 (0x6), region = 143 }
  0x96   :  { %532 = vsyncpa [#allocation3], 1 }
  0x97   :  { %534 = vsyncpa [#allocation3 + $0x1], 1 }
  0x98   :  { %535 = vsyncpa [#allocation4], 1 }
  0x99   :  { %537 = vsyncpa [#allocation4 + $0x1], 1 }

</bundles_post_ra>
